<compile_context>
chip_gen: v6e
topology: v6e:2x2x1
jax: 0.10.0
libtpu: 0.0.40
codegen_flags: <defaults>
</compile_context>

<pallas_src>
import numpy as np
import jax
import jax.numpy as jnp
from jax import lax
from jax.experimental import pallas as pl
from jax.experimental.pallas import tpu as pltpu

INP_LEN = 12      # inp_len from the module
OUT_DIM = 32      # output_dim
C1 = 4            # conv1 out channels
C2 = 4            # conv2 out channels
K = 3             # kernel size
BN_EPS = 1e-5

L1 = INP_LEN - (K - 1)               # 10 : conv1 output length (padding=0)
P1 = L1 // 2                         # 5  : pool1 output length
HALF1 = ((C1 * P1 + 7) // 8) * 8     # 24 : rows per even/odd half (sublane-aligned)
R1 = 2 * HALF1                       # 48 : rows of conv1 im2col matrix

P2 = P1 // 2                         # 2  : pool2 output length (floor mode, pos 4 dropped)
HALF2 = C2 * P2                      # 8  : rows per even/odd half
R2 = 2 * HALF2                       # 16 : rows of conv2 im2col matrix
FEAT = C2 * P2                       # 8  : flattened feature size (channel-major)

# ---------------------------------------------------------------------------
# Static (numpy) assembly tensors mapping raw conv weights/biases into the
# banded im2col matrices used by the kernel.  Row ordering per layer:
#   rows [0, HALF)        -> pooled-even conv positions p = 2*i  (channel-major)
#   rows [HALF, 2*HALF)   -> pooled-odd  conv positions p = 2*i+1
# so MaxPool1d(k=2, s=2) becomes max(top_half, bottom_half).
# ---------------------------------------------------------------------------
_A1 = np.zeros((R1, INP_LEN, C1, K), np.float32)   # conv1: y[c,p] = sum_k w1[c,0,k]*x[p+k]
_B1 = np.zeros((R1, C1), np.float32)
for _c in range(C1):
    for _i in range(P1):
        for _half in range(2):
            _p = 2 * _i + _half
            _r = _half * HALF1 + _c * P1 + _i
            _B1[_r, _c] = 1.0
            for _k in range(K):
                _A1[_r, _p + _k, _c, _k] = 1.0

# conv2 (padding=1) reads pooled p1 laid out as rows ic*P1 + q (q in [0,5)),
# columns 20..23 of the 24-wide input are the zero pad rows of p1.
# Only conv2 positions 0..3 are computed (position 4 is dropped by the pool).
_A2 = np.zeros((R2, HALF1, C2, C1, K), np.float32)
_B2 = np.zeros((R2, C2), np.float32)
for _oc in range(C2):
    for _j in range(P2):
        for _half in range(2):
            _p = 2 * _j + _half
            _r = _half * HALF2 + _oc * P2 + _j
            _B2[_r, _oc] = 1.0
            for _ic in range(C1):
                for _k in range(K):
                    _q = _p - 1 + _k          # padding=1
                    if 0 <= _q < P1:
                        _A2[_r, _ic * P1 + _q, _oc, _ic, _k] = 1.0


def _cnn_kernel(x_ref, w1_ref, b1_ref, w2_ref, b2_ref, wl_ref, bl_ref, o_ref):
    x = x_ref[...]                                                        # (12, TB)

    # conv1 + folded BN + bias + ReLU  -> one MXU matmul
    h1 = jnp.dot(w1_ref[...], x, preferred_element_type=jnp.float32)     # (48, TB)
    h1 = jnp.maximum(h1 + b1_ref[...], 0.0)

    # MaxPool1d(2, 2): even-position half vs odd-position half (tile-aligned)
    p1 = jnp.maximum(h1[:HALF1, :], h1[HALF1:, :])                        # (24, TB)

    # conv2 (padding=1) + folded BN + bias + ReLU -> one MXU matmul
    h2 = jnp.dot(w2_ref[...], p1, preferred_element_type=jnp.float32)    # (16, TB)
    h2 = jnp.maximum(h2 + b2_ref[...], 0.0)

    # MaxPool1d(2, 2) (floor mode already handled by only computing pos 0..3)
    p2 = jnp.maximum(h2[:HALF2, :], h2[HALF2:, :])                        # (8, TB)

    # Linear: (32, 8) @ (8, TB) + bias
    out = jnp.dot(wl_ref[...], p2, preferred_element_type=jnp.float32)
    o_ref[...] = (out + bl_ref[...]).astype(o_ref.dtype)                  # (32, TB)


def cnn_net_forward(x, params, tile_b=1024):
    """x: (B, 1, INP_LEN) float32, like PyTorch Conv1d NCL input."""
    B = x.shape[0]
    assert x.shape[1] == 1 and x.shape[2] == INP_LEN

    (w1, b1, g1, be1, m1, v1,
     w2, b2, g2, be2, m2, v2, wl, bl) = params

    # ---- fold eval-mode BN into the conv weights / biases ----
    s1 = g1 / jnp.sqrt(v1 + BN_EPS)
    b1f = (b1 - m1) * s1 + be1
    w1f = w1[:, 0, :] * s1[:, None]                       # (C1, K)
    s2 = g2 / jnp.sqrt(v2 + BN_EPS)
    b2f = (b2 - m2) * s2 + be2
    w2f = w2 * s2[:, None, None]                          # (C2, C1, K)

    # ---- build banded im2col matrices (tiny; done once per call) ----
    W1p = jnp.einsum('rjck,ck->rj', jnp.asarray(_A1), w1f)        # (48, 12)
    b1p = (jnp.asarray(_B1) @ b1f)[:, None]                       # (48, 1)
    W2p = jnp.einsum('rjoik,oik->rj', jnp.asarray(_A2), w2f)      # (16, 24)
    b2p = (jnp.asarray(_B2) @ b2f)[:, None]                       # (16, 1)
    blp = bl[:, None]                                             # (32, 1)

    # ---- lane-dense layout: batch on the lane axis ----
    xt = x.reshape(B, INP_LEN).astype(jnp.float32).T              # (12, B)
    tb = min(tile_b, pl.cdiv(B, 128) * 128)                       # multiple of 128
    Bp = pl.cdiv(B, tb) * tb
    if Bp != B:
        xt = jnp.pad(xt, ((0, 0), (0, Bp - B)))

    out_t = pl.pallas_call(
        _cnn_kernel,
        out_shape=jax.ShapeDtypeStruct((OUT_DIM, Bp), jnp.float32),
        grid_spec=pltpu.PrefetchScalarGridSpec(
            num_scalar_prefetch=0,
            grid=(Bp // tb,),
            in_specs=[
                pl.BlockSpec((INP_LEN, tb), lambda i: (0, i)),    # x (batch-tiled)
                pl.BlockSpec((R1, INP_LEN), lambda i: (0, 0)),    # W1p
                pl.BlockSpec((R1, 1), lambda i: (0, 0)),          # b1p
                pl.BlockSpec((R2, HALF1), lambda i: (0, 0)),      # W2p
                pl.BlockSpec((R2, 1), lambda i: (0, 0)),          # b2p
                pl.BlockSpec((OUT_DIM, FEAT), lambda i: (0, 0)),  # wl
                pl.BlockSpec((OUT_DIM, 1), lambda i: (0, 0)),     # bl
            ],
            out_specs=pl.BlockSpec((OUT_DIM, tb), lambda i: (0, i)),
        ),
        compiler_params=pltpu.CompilerParams(
            dimension_semantics=("parallel",)),
    )(xt, W1p, b1p, W2p, b2p, wl, blp)

    return out_t.T[:B]                                            # (B, OUT_DIM)


def reference_forward(x, params):
    """Pure-JAX reference mirroring the PyTorch module (BN in eval mode)."""
    (w1, b1, g1, be1, m1, v1,
     w2, b2, g2, be2, m2, v2, wl, bl) = params
    B = x.shape[0]
    dn = ('NCH', 'OIH', 'NCH')

    def bn(y, g, be, m, v):
        return g[None, :, None] * (y - m[None, :, None]) / \
            jnp.sqrt(v[None, :, None] + BN_EPS) + be[None, :, None]

    y = lax.conv_general_dilated(x, w1, (1,), [(0, 0)], dimension_numbers=dn)
    y = y + b1[None, :, None]
    y = jnp.maximum(bn(y, g1, be1, m1, v1), 0.0)                   # (B, 4, 10)
    y = y.reshape(B, C1, 5, 2).max(axis=-1)                        # (B, 4, 5)

    y = lax.conv_general_dilated(y, w2, (1,), [(1, 1)], dimension_numbers=dn)
    y = y + b2[None, :, None]
    y = jnp.maximum(bn(y, g2, be2, m2, v2), 0.0)                   # (B, 4, 5)
    y = y[:, :, :4].reshape(B, C2, 2, 2).max(axis=-1)              # (B, 4, 2)

    feats = y.reshape(B, -1)                                       # (B, 8)
    return feats @ wl.T + bl[None, :]


def init_params(key):
    ks = jax.random.split(key, 10)
    w1 = 0.5 * jax.random.normal(ks[0], (C1, 1, K), jnp.float32)
    b1 = 0.1 * jax.random.normal(ks[1], (C1,), jnp.float32)
    g1 = 1.0 + 0.1 * jax.random.normal(ks[2], (C1,), jnp.float32)
    be1 = 0.1 * jax.random.normal(ks[3], (C1,), jnp.float32)
    m1 = jnp.zeros((C1,), jnp.float32)          # fresh running stats
    v1 = jnp.ones((C1,), jnp.float32)
    w2 = 0.3 * jax.random.normal(ks[4], (C2, C1, K), jnp.float32)
    b2 = 0.1 * jax.random.normal(ks[5], (C2,), jnp.float32)
    g2 = 1.0 + 0.1 * jax.random.normal(ks[6], (C2,), jnp.float32)
    be2 = 0.1 * jax.random.normal(ks[7], (C2,), jnp.float32)
    m2 = jnp.zeros((C2,), jnp.float32)
    v2 = jnp.ones((C2,), jnp.float32)
    wl = 0.2 * jax.random.normal(ks[8], (OUT_DIM, FEAT), jnp.float32)
    bl = 0.1 * jax.random.normal(ks[9], (OUT_DIM,), jnp.float32)
    return (w1, b1, g1, be1, m1, v1, w2, b2, g2, be2, m2, v2, wl, bl)


if __name__ == "__main__":
    # TODO(synk): BatchNorm training-mode running-stat updates are not modeled;
    # the kernel implements eval-mode BN folded into the conv weights.
    B = 8
    key = jax.random.PRNGKey(0)
    kx, kp = jax.random.split(key)
    x = jax.random.normal(kx, (B, 1, INP_LEN), jnp.float32)
    params = init_params(kp)

    out = cnn_net_forward(x, params)
    out = jax.block_until_ready(out)

    ref = reference_forward(x, params)
    np.testing.assert_allclose(np.asarray(out), np.asarray(ref), rtol=1e-4, atol=1e-4)
    print("KERNEL_OK")
</pallas_src>

<mosaic_0001>
module attributes {stable_mosaic.version = 11 : i64} {
  func.func @_cnn_kernel(%arg0: i32, %arg1: memref<12x128xf32, #tpu.memory_space<vmem>>, %arg2: memref<48x12xf32, #tpu.memory_space<vmem>>, %arg3: memref<48x1xf32, #tpu.memory_space<vmem>>, %arg4: memref<16x24xf32, #tpu.memory_space<vmem>>, %arg5: memref<16x1xf32, #tpu.memory_space<vmem>>, %arg6: memref<32x8xf32, #tpu.memory_space<vmem>>, %arg7: memref<32x1xf32, #tpu.memory_space<vmem>>, %arg8: memref<32x128xf32, #tpu.memory_space<vmem>>) attributes {dimension_semantics = [#tpu.dimension_semantics<parallel>], iteration_bounds = array<i64: 1>, scalar_prefetch = 0 : i64, scratch_operands = 0 : i64, tpu.core_type = #tpu.core_type<tc>, window_params = [{transform_indices = @transform_0, window_bounds = array<i64: 12, 128>}, {pipeline_mode = #tpu.pipeline_mode<synchronous>, transform_indices = @transform_1, window_bounds = array<i64: 48, 12>}, {pipeline_mode = #tpu.pipeline_mode<synchronous>, transform_indices = @transform_2, window_bounds = array<i64: 48, 1>}, {pipeline_mode = #tpu.pipeline_mode<synchronous>, transform_indices = @transform_3, window_bounds = array<i64: 16, 24>}, {pipeline_mode = #tpu.pipeline_mode<synchronous>, transform_indices = @transform_4, window_bounds = array<i64: 16, 1>}, {pipeline_mode = #tpu.pipeline_mode<synchronous>, transform_indices = @transform_5, window_bounds = array<i64: 32, 8>}, {pipeline_mode = #tpu.pipeline_mode<synchronous>, transform_indices = @transform_6, window_bounds = array<i64: 32, 1>}, {transform_indices = @transform_7, window_bounds = array<i64: 32, 128>}]} {
    %c0 = arith.constant 0 : index
    %c0_0 = arith.constant 0 : index
    %0 = vector.load %arg1[%c0, %c0_0] : memref<12x128xf32, #tpu.memory_space<vmem>>, vector<12x128xf32>
    %c0_1 = arith.constant 0 : index
    %c0_2 = arith.constant 0 : index
    %1 = vector.load %arg2[%c0_1, %c0_2] : memref<48x12xf32, #tpu.memory_space<vmem>>, vector<48x12xf32>
    %cst = arith.constant dense<0.000000e+00> : vector<48x128xf32>
    %2 = tpu.matmul %1, %0, %cst {dimension_numbers = #tpu.dot_dimension_numbers<[1], [0], [0], [1], [0, 0, 1, 1], [], []>} : vector<48x12xf32>, vector<12x128xf32>, vector<48x128xf32> -> vector<48x128xf32>
    %c0_3 = arith.constant 0 : index
    %c0_4 = arith.constant 0 : index
    %3 = vector.load %arg3[%c0_3, %c0_4] : memref<48x1xf32, #tpu.memory_space<vmem>>, vector<48x1xf32>
    %4 = vector.broadcast %3 : vector<48x1xf32> to vector<48x128xf32>
    %5 = arith.addf %2, %4 : vector<48x128xf32>
    %cst_5 = arith.constant 0.000000e+00 : f32
    %6 = vector.broadcast %cst_5 : f32 to vector<48x128xf32>
    %7 = arith.maximumf %5, %6 : vector<48x128xf32>
    %8 = vector.extract_strided_slice %7 {offsets = [0, 0], sizes = [24, 128], strides = [1, 1]} : vector<48x128xf32> to vector<24x128xf32>
    %9 = vector.extract_strided_slice %7 {offsets = [24, 0], sizes = [24, 128], strides = [1, 1]} : vector<48x128xf32> to vector<24x128xf32>
    %10 = arith.maximumf %8, %9 : vector<24x128xf32>
    %c0_6 = arith.constant 0 : index
    %c0_7 = arith.constant 0 : index
    %11 = vector.load %arg4[%c0_6, %c0_7] : memref<16x24xf32, #tpu.memory_space<vmem>>, vector<16x24xf32>
    %cst_8 = arith.constant dense<0.000000e+00> : vector<16x128xf32>
    %12 = tpu.matmul %11, %10, %cst_8 {dimension_numbers = #tpu.dot_dimension_numbers<[1], [0], [0], [1], [0, 0, 1, 1], [], []>} : vector<16x24xf32>, vector<24x128xf32>, vector<16x128xf32> -> vector<16x128xf32>
    %c0_9 = arith.constant 0 : index
    %c0_10 = arith.constant 0 : index
    %13 = vector.load %arg5[%c0_9, %c0_10] : memref<16x1xf32, #tpu.memory_space<vmem>>, vector<16x1xf32>
    %14 = vector.broadcast %13 : vector<16x1xf32> to vector<16x128xf32>
    %15 = arith.addf %12, %14 : vector<16x128xf32>
    %cst_11 = arith.constant 0.000000e+00 : f32
    %16 = vector.broadcast %cst_11 : f32 to vector<16x128xf32>
    %17 = arith.maximumf %15, %16 : vector<16x128xf32>
    %18 = vector.extract_strided_slice %17 {offsets = [0, 0], sizes = [8, 128], strides = [1, 1]} : vector<16x128xf32> to vector<8x128xf32>
    %19 = vector.extract_strided_slice %17 {offsets = [8, 0], sizes = [8, 128], strides = [1, 1]} : vector<16x128xf32> to vector<8x128xf32>
    %20 = arith.maximumf %18, %19 : vector<8x128xf32>
    %c0_12 = arith.constant 0 : index
    %c0_13 = arith.constant 0 : index
    %21 = vector.load %arg6[%c0_12, %c0_13] : memref<32x8xf32, #tpu.memory_space<vmem>>, vector<32x8xf32>
    %cst_14 = arith.constant dense<0.000000e+00> : vector<32x128xf32>
    %22 = tpu.matmul %21, %20, %cst_14 {dimension_numbers = #tpu.dot_dimension_numbers<[1], [0], [0], [1], [0, 0, 1, 1], [], []>} : vector<32x8xf32>, vector<8x128xf32>, vector<32x128xf32> -> vector<32x128xf32>
    %c0_15 = arith.constant 0 : index
    %c0_16 = arith.constant 0 : index
    %23 = vector.load %arg7[%c0_15, %c0_16] : memref<32x1xf32, #tpu.memory_space<vmem>>, vector<32x1xf32>
    %24 = vector.broadcast %23 : vector<32x1xf32> to vector<32x128xf32>
    %25 = arith.addf %22, %24 : vector<32x128xf32>
    %c0_17 = arith.constant 0 : index
    %c0_18 = arith.constant 0 : index
    %26 = vector.load %arg8[%c0_17, %c0_18] : memref<32x128xf32, #tpu.memory_space<vmem>>, vector<32x128xf32>
    tpu.vector_store %arg8[%c0_17, %c0_18], %25 {strides = array<i32>} : memref<32x128xf32, #tpu.memory_space<vmem>>, vector<32x128xf32>,
    return
  }
  func.func @transform_0(%arg0: i32) -> (i32, i32) {
    %c0_i32 = arith.constant 0 : i32
    %c0_i32_0 = arith.constant 0 : i32
    return %c0_i32, %arg0 : i32, i32
  }
  func.func @transform_1(%arg0: i32) -> (i32, i32) {
    %c0_i32 = arith.constant 0 : i32
    %c0_i32_0 = arith.constant 0 : i32
    %c0_i32_1 = arith.constant 0 : i32
    return %c0_i32, %c0_i32_0 : i32, i32
  }
  func.func @transform_2(%arg0: i32) -> (i32, i32) {
    %c0_i32 = arith.constant 0 : i32
    %c0_i32_0 = arith.constant 0 : i32
    %c0_i32_1 = arith.constant 0 : i32
    return %c0_i32, %c0_i32_0 : i32, i32
  }
  func.func @transform_3(%arg0: i32) -> (i32, i32) {
    %c0_i32 = arith.constant 0 : i32
    %c0_i32_0 = arith.constant 0 : i32
    %c0_i32_1 = arith.constant 0 : i32
    return %c0_i32, %c0_i32_0 : i32, i32
  }
  func.func @transform_4(%arg0: i32) -> (i32, i32) {
    %c0_i32 = arith.constant 0 : i32
    %c0_i32_0 = arith.constant 0 : i32
    %c0_i32_1 = arith.constant 0 : i32
    return %c0_i32, %c0_i32_0 : i32, i32
  }
  func.func @transform_5(%arg0: i32) -> (i32, i32) {
    %c0_i32 = arith.constant 0 : i32
    %c0_i32_0 = arith.constant 0 : i32
    %c0_i32_1 = arith.constant 0 : i32
    return %c0_i32, %c0_i32_0 : i32, i32
  }
  func.func @transform_6(%arg0: i32) -> (i32, i32) {
    %c0_i32 = arith.constant 0 : i32
    %c0_i32_0 = arith.constant 0 : i32
    %c0_i32_1 = arith.constant 0 : i32
    return %c0_i32, %c0_i32_0 : i32, i32
  }
  func.func @transform_7(%arg0: i32) -> (i32, i32) {
    %c0_i32 = arith.constant 0 : i32
    %c0_i32_0 = arith.constant 0 : i32
    return %c0_i32, %arg0 : i32, i32
  }
}

</mosaic_0001>

<bundles_post_ra>
// kernel: tpu_custom_call.1
= control target key start
LH: loop header
LB: loop body
LE: loop exit
PB: predicated region body
PF: predicated region fallthrough
CT: control target
= control target key end

     0   :  { %vm90_vm0 = vcmask 1043456   ;;  %vm71_vm1 = vcmask 97280   ;;  %v532_v4 = vmov 0   ;;  %s669_s0 = inlined_call_operand.vmem [shape: f32[12,128], index: 0, kind: input, shape index: {}]   ;;  %s670_s1 = inlined_call_operand.vmem [shape: f32[48,12], index: 1, kind: input, shape index: {}]   ;;  %s671_s2 = inlined_call_operand.vmem [shape: f32[48,1], index: 2, kind: input, shape index: {}]   ;;  %s672_s3 = inlined_call_operand.vmem [shape: f32[16,24], index: 3, kind: input, shape index: {}]   ;;  %s673_s4 = inlined_call_operand.vmem [shape: f32[16,1], index: 4, kind: input, shape index: {}]   ;;  %s674_s5 = inlined_call_operand.vmem [shape: f32[32,8], index: 5, kind: input, shape index: {}]   ;;  %s675_s6 = inlined_call_operand.vmem [shape: f32[32,1], index: 6, kind: input, shape index: {}]   ;;  %s676_s7 = inlined_call_operand.hbm [shape: f32[32,128], index: 7, kind: output, shape index: {}]  }
   0x1   :  { %v28_v0 = vld [vmem:[%s669_s0 + $0x8] sm:$0xf]  ;;  %v27_v1 = vld [vmem:[%s669_s0] sm:$0xff]  ;;  %509 = vset.pattern.permute.xlu1 %v532_v4  ;;  %v37_v5 = vld [vmem:[%s671_s2 + $0x10] sm:$0xff]  ;;  %508 = vset.pattern.permute.xlu0 %v532_v4 }
   0x2   :  { %v29_v2 = vld [vmem:[%s670_s1] sm:$0xff]  ;;  %474 = vmatprep.subr.msk.mxu0 %vm90_vm0, %v28_v0  ;;  %v30_v3 = vld [vmem:[%s670_s1 + $0x8] sm:$0xff]  ;;  %v31_v6 = vld [vmem:[%s670_s1 + $0x10] sm:$0xff]  ;;  %53 = vperm.xlu0 %508, %v37_v5  }
   0x3   :  { %478 = vmatprep.mubr.msk.f32.mxu0 %vm71_vm1, %v29_v2  ;;  %475 = vmatpush3.msk.msra.mxu0 %vm90_vm0, %v28_v0  ;;  %v36_v7 = vld [vmem:[%s671_s2 + $0x8] sm:$0xff]  ;;  %v32_v9 = vld [vmem:[%s670_s1 + $0x18] sm:$0xff]  ;;  %v39_v10 = vld [vmem:[%s671_s2 + $0x20] sm:$0xff] }
   0x4   :  { %476 = vmatprep.subr.mxu0 %v27_v1  ;;  %48 = vperm.xlu1 %509, %v36_v7   ;;  %v40_v8 = vld [vmem:[%s671_s2 + $0x28] sm:$0xff] }
   0x5   :  { %477 = vmatpush3.msra.mxu0 %v27_v1 }
   0x6   :  { %479 = vmatmul.mubr.msk.f32.vlgmr.msra.gmra.mxu0 %vm71_vm1, %v30_v3 }
   0x7   :  { %481 = vmatprep.mubr.msk.f32.mxu0 %vm71_vm1, %v31_v6 }
   0x8   :  { %12 = vsyncpa [#allocation3], 0  ;;  %v33_v11 = vld [vmem:[%s670_s1 + $0x20] sm:$0xff]  ;;  %68 = vperm.xlu0 %508, %v40_v8   ;;  %63 = vperm.xlu1 %509, %v39_v10   ;;  %v34_v13 = vld [vmem:[%s670_s1 + $0x28] sm:$0xff]  ;;  %vm212_vm2 = vcmask 195584   ;;  %vm325_vm3 = vcmask 64512  }
   0x9   :  { %v35_v12 = vld [vmem:[%s671_s2] sm:$0xff]  ;;  %v38_v14 = vld [vmem:[%s671_s2 + $0x18] sm:$0xff]  ;;  %v201_v16 = vld [vmem:[%s673_s4 + $0x8] sm:$0xff]  ;;  %s533_s23 = smov [#allocation2]  }
   0xa   :  { %482 = vmatmul.mubr.msk.f32.gmra.mxu0 %vm71_vm1, %v32_v9  ;;  %v200_v15 = vld [vmem:[%s673_s4] sm:$0xff]  ;;  %v302_v18 = vld [vmem:[%s675_s6 + $0x8] sm:$0xff]  ;;  %v303_v19 = vld [vmem:[%s675_s6 + $0x10] sm:$0xff]  ;;  %s432_s24 = sshll.u32 %s533_s23, 4  ;;  %s433_s24 = int_to_ptr.vmem [resolvable:$true] %s432_s24 }
   0xb   :  { %484 = vmatprep.mubr.msk.f32.mxu0 %vm71_vm1, %v33_v11  ;;  %v301_v17 = vld [vmem:[%s675_s6] sm:$0xff]  ;;  %v304_v20 = vld [vmem:[%s675_s6 + $0x18] sm:$0xff]  ;;  %v199_v49 = vld [vmem:[%s672_s3 + $0x8] sm:$0xff]  ;;  %p515_p1 = scmp.lt.s32.totalorder %s433_s24, %s433_s24 }
   0xc   :  { %43 = vperm.xlu0 %508, %v35_v12   ;;  %58 = vperm.xlu1 %509, %v38_v14   ;;  %v198_v21 = vld [vmem:[%s672_s3] sm:$0xff]  ;;  %v298_v60 = vld [vmem:[%s674_s5 + $0x8] sm:$0xff]  ;;  %v299_v61 = vld [vmem:[%s674_s5 + $0x10] sm:$0xff] }
   0xd   :  { %493 = vmatprep.mubr.msk.f32.mxu1 %vm212_vm2, %v198_v21  ;;  %v297_v50 = vld [vmem:[%s674_s5] sm:$0xff]  ;;  %v300_v62 = vld [vmem:[%s674_s5 + $0x18] sm:$0xff]  ;;  %s510_s5 = scalar_lea.vmem %s433_s24, 512 }
   0xe   :  { %485 = vmatmul.mubr.msk.f32.gmra.mxu0 %vm71_vm1, %v34_v13  ;;  %p511_p0 = scmp.ne.s32.totalorder %s433_s24, %s510_s5  ;;  %p516_p2 = scmp.lt.s32.totalorder %s510_s5, %s510_s5 }
  0x10   :  { %204 = vperm.xlu0 %508, %v200_v15   ;;  %209 = vperm.xlu1 %509, %v201_v16   ;;  %p517_p3 = por %p516_p2, %p515_p1 }
  0x12   :  { %p518_p4 = pnand %p517_p3, %p511_p0 }
  0x14   :  { %307 = vperm.xlu0 %508, %v301_v17   ;;  %312 = vperm.xlu1 %509, %v302_v18  }
  0x18   :  { %317 = vperm.xlu0 %508, %v303_v19   ;;  %322 = vperm.xlu1 %509, %v304_v20  }
  0x7d   :  { %v54_v23 = vpop.permute.xlu0 %53 }
  0x7f   :  { %v49_v22 = vpop.permute.xlu1 %48 }
  0x83   :  { %v64_v25 = vpop.permute.xlu1 %63  ;;  %v69_v27 = vpop.permute.xlu0 %68 }
  0x87   :  { %v59_v31 = vpop.permute.xlu1 %58  ;;  %v44_v36 = vpop.permute.xlu0 %43 }
  0x8b   :  { %v210_v51 = vpop.permute.xlu1 %209  ;;  %v205_v54 = vpop.permute.xlu0 %204 }
  0x8f   :  { %v313_v63 = vpop.permute.xlu1 %312  ;;  %v308_v0 = vpop.permute.xlu0 %307 }
  0x93   :  { %v323_v5 = vpop.permute.xlu1 %322  ;;  %v318_v8 = vpop.permute.xlu0 %317 }
  0xc6   :  { %v480_v24 = vpop.f32.mrf.mxu0 }
  0xc7   :  { %v166_v33 = vadd.f32 %v480_v24, %v49_v22 }
  0xc8   :  { %v160_v26 = vpop.f32.mrf.mxu0 }
  0xc9   :  { %v161_v38 = vadd.f32 %v160_v26, %v44_v36  ;;  %v190_v42 = vmax.f32 %v166_v33, 0.0 }
  0xca   :  { %v483_v28 = vpop.f32.mrf.mxu0 }
  0xcb   :  { %v176_v34 = vadd.f32 %v483_v28, %v59_v31  ;;  %v189_v46 = vmax.f32 %v161_v38, 0.0 }
  0xcc   :  { %v170_v29 = vpop.f32.mrf.mxu0 }
  0xcd   :  { %v171_v30 = vadd.f32 %v170_v29, %v54_v23  ;;  %v192_v43 = vmax.f32 %v176_v34, 0.0 }
  0xce   :  { %v486_v32 = vpop.f32.mrf.mxu0 }
  0xcf   :  { %v186_v35 = vadd.f32 %v486_v32, %v69_v27  ;;  %v191_v39 = vmax.f32 %v171_v30, 0.0  ;;  %v195_v48 = vmax.f32 %v189_v46, %v192_v43 }
  0xd0   :  { %v180_v37 = vpop.f32.mrf.mxu0 }
  0xd1   :  { %v194_v40 = vmax.f32 %v186_v35, 0.0  ;;  %v181_v41 = vadd.f32 %v180_v37, %v64_v25 }
  0xd3   :  { %v193_v44 = vmax.f32 %v181_v41, 0.0  ;;  %v197_v45 = vmax.f32 %v191_v39, %v194_v40 }
  0xd5   :  { %v196_v47 = vmax.f32 %v190_v42, %v193_v44  ;;  %487 = vmatprep.subr.mxu1 %v197_v45 }
  0xd6   :  { %488 = vmatpush3.msra.mxu1 %v197_v45 }
  0xd7   :  { %489 = vmatprep.subr.mxu1 %v196_v47 }
  0xd8   :  { %490 = vmatpush3.msra.mxu1 %v196_v47 }
  0xd9   :  { %491 = vmatprep.subr.mxu1 %v195_v48 }
  0xda   :  { %492 = vmatpush3.msra.mxu1 %v195_v48 }
  0xdb   :  { %494 = vmatmul.mubr.msk.f32.vlgmr.msra.gmra.mxu1 %vm212_vm2, %v199_v49 }
  0xdc   :  { %498 = vmatprep.mubr.msk.f32.mxu1 %vm325_vm3, %v297_v50 }
 0x19b   :  { %v495_v52 = vpop.f32.mrf.mxu1 }
 0x19c   :  { %v291_v53 = vadd.f32 %v495_v52, %v210_v51 }
 0x19d   :  { %v285_v55 = vpop.f32.mrf.mxu1 }
 0x19e   :  { %v286_v56 = vadd.f32 %v285_v55, %v205_v54  ;;  %v295_v57 = vmax.f32 %v291_v53, 0.0 }
 0x1a0   :  { %v294_v58 = vmax.f32 %v286_v56, 0.0 }
 0x1a2   :  { %v296_v59 = vmax.f32 %v294_v58, %v295_v57 }
 0x1a4   :  { %496 = vmatprep.subr.mxu1 %v296_v59 }
 0x1a5   :  { %497 = vmatpush3.msra.mxu1 %v296_v59 }
 0x1a6   :  { %499 = vmatmul.mubr.msk.f32.vlgmr.msra.gmra.mxu1 %vm325_vm3, %v298_v60 }
 0x1a7   :  { %501 = vmatprep.mubr.msk.f32.mxu1 %vm325_vm3, %v299_v61 }
 0x1aa   :  { %502 = vmatmul.mubr.msk.f32.gmra.mxu1 %vm325_vm3, %v300_v62 }
 0x266   :  { %v500_v1 = vpop.f32.mrf.mxu1 }
 0x267   :  { %v410_v2 = vadd.f32 %v500_v1, %v313_v63 }
 0x268   :  { %v404_v3 = vpop.f32.mrf.mxu1 }
 0x269   :  { %424 = vst [vmem:[#allocation2 + $0x8] sm:$0xff] %v410_v2  ;;  %v405_v4 = vadd.f32 %v404_v3, %v308_v0 }
 0x26a   :  { %v503_v6 = vpop.f32.mrf.mxu1 }
 0x26b   :  { %423 = vst [vmem:[#allocation2] sm:$0xff] %v405_v4  ;;  %v420_v7 = vadd.f32 %v503_v6, %v323_v5 }
 0x26c   :  { %v414_v9 = vpop.f32.mrf.mxu1 }
 0x26d   :  { %426 = vst [vmem:[#allocation2 + $0x18] sm:$0xff] %v420_v7  ;;  %v415_v10 = vadd.f32 %v414_v9, %v318_v8 }
 0x26f   :  { %425 = vst [vmem:[#allocation2 + $0x10] sm:$0xff] %v415_v10 }
 0x270   :  { %521 = shalt.err (!%p518_p4)
}
 0x271   :  { %s534_s25 = smov 128   ;;  %s535_s26 = smov 8  }
 0x272   :  { %438 = dma.vmem_to_hbm [thread:$0]  %s433_s24, 512, %s676_s7, [#allocation3], %s534_s25, %s534_s25, %s535_s26  }
 0x273   :  { %530 = dma.done.wait [#allocation3], 512  }
 0x274   :  { %531 = vsyncadd [#allocation3], 4294966784 }
 0x275   :  { %442 = vsyncpa [#allocation3], 1 }

</bundles_post_ra>
